<compile_context>
chip_gen: v5e
topology: v5e:2x2
jax: 0.10.0
libtpu: 0.0.40
codegen_flags: <defaults>
</compile_context>

<pallas_src>
import math

import jax
import jax.numpy as jnp
from jax import lax
from jax.experimental import pallas as pl
from jax.experimental.pallas import tpu as pltpu


def _round_up(x, m):
    return ((x + m - 1) // m) * m


def gru_cell_kernel(xh_ref, w_ref, b_ref, out_ref, acc_ref):
    """One batch-tile of the GRU cell.

    xh_ref  : (TB, Kp)    bf16  [h | x] pack; h occupies cols [0:H] (lane
                                 aligned at column 0), x occupies [Hp:Hp+C].
    w_ref   : (Kp, 4*Hp)  bf16  fused weights, gate blocks
                                 [reset | input | new(x-path) | new(h-path)].
    b_ref   : (1, 4*Hp)   f32   fused biases [bx_r+bh_r | bx_i+bh_i | bx_n | bh_n].
    out_ref : (TB, Hp)    f32   new hidden state (lane padded).
    acc_ref : (TB, 4*Hp)  f32   VMEM scratch holding the matmul result.
    """
    TB, Hp = out_ref.shape

    # Single MXU pass for all four gate blocks (f32 accumulation); bias added
    # once; result parked in VMEM scratch so the epilogue can stream it.
    acc_ref[...] = jnp.dot(xh_ref[...], w_ref[...],
                           preferred_element_type=jnp.float32) + b_ref[...]

    # Gate epilogue streamed over row sub-chunks to bound vreg pressure
    # (at TB=128/256 the full (TB, 4*Hp) f32 result alone would overflow the
    # 64-vreg file and spill).  RC always divides TB (TB is a multiple of 16).
    RC = 32 if TB % 32 == 0 else 16
    RC = min(RC, TB)

    def epilogue(c, carry):
        r0 = pl.multiple_of(c * RC, RC)
        rows = pl.ds(r0, RC)
        resetgate = jax.nn.sigmoid(acc_ref[rows, 0:Hp])
        inputgate = jax.nn.sigmoid(acc_ref[rows, Hp:2 * Hp])
        newgate = jnp.tanh(acc_ref[rows, 2 * Hp:3 * Hp]
                           + resetgate * acc_ref[rows, 3 * Hp:4 * Hp])
        h = xh_ref[rows, 0:Hp].astype(jnp.float32)   # lane-aligned re-read of h
        out_ref[rows, :] = ((1.0 - inputgate) * newgate
                            + inputgate * h).astype(out_ref.dtype)
        return carry

    lax.fori_loop(0, TB // RC, epilogue, None, unroll=True)


def prepare_gru_params(wx, bx, wh, bh):
    """One-time weight prep (hoisted out of the per-timestep hot path).

    wx: (3H, C_in), wh: (3H, H), bx/bh: (3H,)  -- torch nn.Linear layout,
    gate order [reset | input | new] along the 3H axis (torch chunk(3, 1)).

    Builds a single fused weight matrix with four lane-padded gate blocks:
      block 0: reset   = x@Wx_r + h@Wh_r   (+ bx_r + bh_r)
      block 1: input   = x@Wx_i + h@Wh_i   (+ bx_i + bh_i)
      block 2: new/x   = x@Wx_n            (+ bx_n)
      block 3: new/h   = h@Wh_n            (+ bh_n)
    Row layout matches the [h | x] activation pack: h-rows at [0:H] (lane
    aligned), x-rows at [Hp:Hp+C_in].
    """
    threeH, c_in = wx.shape
    H = threeH // 3
    Hp = _round_up(H, 128)                # lane-padded gate width
    Kp = _round_up(Hp + c_in, 128)        # padded contraction dim for [h | x]

    wx_t = jnp.asarray(wx, jnp.float32).T    # (C_in, 3H)
    wh_t = jnp.asarray(wh, jnp.float32).T    # (H, 3H)
    bx = jnp.asarray(bx, jnp.float32)
    bh = jnp.asarray(bh, jnp.float32)

    w_big = jnp.zeros((Kp, 4 * Hp), jnp.float32)
    b_big = jnp.zeros((1, 4 * Hp), jnp.float32)

    # reset / input gates: x- and h-paths summed by the matmul, biases pre-summed.
    for g in range(2):
        w_big = w_big.at[0:H, g * Hp:g * Hp + H].set(wh_t[:, g * H:(g + 1) * H])
        w_big = w_big.at[Hp:Hp + c_in, g * Hp:g * Hp + H].set(
            wx_t[:, g * H:(g + 1) * H])
        b_big = b_big.at[0, g * Hp:g * Hp + H].set(
            bx[g * H:(g + 1) * H] + bh[g * H:(g + 1) * H])
    # new gate, x-path (block 2).
    w_big = w_big.at[Hp:Hp + c_in, 2 * Hp:2 * Hp + H].set(wx_t[:, 2 * H:3 * H])
    b_big = b_big.at[0, 2 * Hp:2 * Hp + H].set(bx[2 * H:3 * H])
    # new gate, h-path (block 3) -- kept un-summed so it can be scaled by r.
    w_big = w_big.at[0:H, 3 * Hp:3 * Hp + H].set(wh_t[:, 2 * H:3 * H])
    b_big = b_big.at[0, 3 * Hp:3 * Hp + H].set(bh[2 * H:3 * H])

    return dict(
        w_big=w_big.astype(jnp.bfloat16),
        b_big=b_big,
        c_in=c_in, H=H, Hp=Hp, Kp=Kp,
    )


def _large_batch_tile():
    # 256-row tiles match the 2x256x256 MXUs on v6e/v7x; v5e's MXUs are 128-wide.
    try:
        kind = jax.devices()[0].device_kind.lower()
    except Exception:
        return 256
    if "v5 lite" in kind or "v5e" in kind or "v5lite" in kind:
        return 128
    return 256


def gru_cell(x, hidden, params):
    """x: (B, C_in) (or (..., C_in), flattened like torch .view); hidden: (B, H)."""
    x2d = x.reshape(-1, x.shape[-1])
    B = x2d.shape[0]
    c_in, H, Hp, Kp = params["c_in"], params["H"], params["Hp"], params["Kp"]

    # Batch tile: multiple of 16 (bf16 sublane tile), >=2 "parallel" tiles for
    # mid-size batches (keeps both v7x TensorCores busy), MXU-sized tiles for
    # large batches (256 on v6e/v7x, 128 on v5e).
    tb_big = _large_batch_tile()
    if B <= 32:
        TB = _round_up(B, 16)
    elif B <= 2 * tb_big:
        TB = _round_up((B + 1) // 2, 16)
    else:
        TB = tb_big
    B_pad = _round_up(B, TB)

    # Single bf16 activation pack [h | x]; h sits lane-aligned at column 0 so
    # the kernel reuses it for the blend (no duplicate f32 h input per step).
    xh = jnp.zeros((B_pad, Kp), jnp.bfloat16)
    xh = xh.at[:B, :H].set(hidden.astype(jnp.bfloat16))
    xh = xh.at[:B, Hp:Hp + c_in].set(x2d.astype(jnp.bfloat16))

    # VMEM budget: double-buffered activation/out tiles, weights + bias
    # (double-buffered by default), plus the f32 accumulator scratch.
    est = (2 * TB * Kp * 2 + 2 * TB * Hp * 4
           + 2 * (Kp * 4 * Hp * 2 + 4 * Hp * 4)
           + TB * 4 * Hp * 4)
    vmem_limit = int(min(100 * 2 ** 20, max(32 * 2 ** 20, est * 5 // 4)))

    out = pl.pallas_call(
        gru_cell_kernel,
        out_shape=jax.ShapeDtypeStruct((B_pad, Hp), jnp.float32),
        grid=(B_pad // TB,),
        in_specs=[
            pl.BlockSpec((TB, Kp), lambda i: (i, 0)),        # [h | x] pack
            pl.BlockSpec((Kp, 4 * Hp), lambda i: (0, 0)),    # fused weights
            pl.BlockSpec((1, 4 * Hp), lambda i: (0, 0)),     # fused biases
        ],
        out_specs=pl.BlockSpec((TB, Hp), lambda i: (i, 0)),
        scratch_shapes=[pltpu.VMEM((TB, 4 * Hp), jnp.float32)],
        compiler_params=pltpu.CompilerParams(
            dimension_semantics=("parallel",),
            vmem_limit_bytes=vmem_limit),
    )(xh, params["w_big"], params["b_big"])

    return out[:B, :H]


def reference_gru(x, hidden, wx, bx, wh, bh, matmul_dtype=None):
    """Pure-JAX reference matching the torch module.  If matmul_dtype is given,
    x / h / weights are quantized to it (mirrors the bf16 kernel inputs)."""
    x2d = x.reshape(-1, x.shape[-1]).astype(jnp.float32)
    h = hidden.astype(jnp.float32)
    if matmul_dtype is not None:
        q = lambda a: a.astype(matmul_dtype).astype(jnp.float32)
        x_mm, h_mm, wx_mm, wh_mm = q(x2d), q(h), q(wx), q(wh)
        h_blend = q(h)     # kernel reuses the bf16 pack of h for the blend
    else:
        x_mm, h_mm = x2d, h
        wx_mm, wh_mm = wx.astype(jnp.float32), wh.astype(jnp.float32)
        h_blend = h
    gate_x = x_mm @ wx_mm.T + bx
    gate_h = h_mm @ wh_mm.T + bh
    H = hidden.shape[1]
    i_r, i_i, i_n = gate_x[:, :H], gate_x[:, H:2 * H], gate_x[:, 2 * H:]
    h_r, h_i, h_n = gate_h[:, :H], gate_h[:, H:2 * H], gate_h[:, 2 * H:]
    resetgate = jax.nn.sigmoid(i_r + h_r)
    inputgate = jax.nn.sigmoid(i_i + h_i)
    newgate = jnp.tanh(i_n + resetgate * h_n)
    return (1.0 - inputgate) * newgate + inputgate * h_blend


if __name__ == "__main__":
    inplance = 16
    hidden_size = 32
    batch = 8

    key = jax.random.PRNGKey(0)
    kx, kh, k1, k2, k3, k4 = jax.random.split(key, 6)

    # Deterministic parameter init matching reset_parameters(): U(-std, std).
    std = 1.0 / math.sqrt(hidden_size)
    wx = jax.random.uniform(k1, (3 * hidden_size, inplance), jnp.float32, -std, std)
    bx = jax.random.uniform(k2, (3 * hidden_size,), jnp.float32, -std, std)
    wh = jax.random.uniform(k3, (3 * hidden_size, hidden_size), jnp.float32, -std, std)
    bh = jax.random.uniform(k4, (3 * hidden_size,), jnp.float32, -std, std)

    x = jax.random.normal(kx, (batch, inplance), jnp.float32)
    hidden = jax.random.normal(kh, (batch, hidden_size), jnp.float32)

    # One-time (hoisted) weight preparation, then the fused kernel call.
    params = prepare_gru_params(wx, bx, wh, bh)
    out = gru_cell(x, hidden, params)
    jax.block_until_ready(out)
    assert out.shape == (batch, hidden_size)

    # Tight check against a bf16-faithful reference (f32 accumulation/gates).
    ref_bf16 = reference_gru(x, hidden, wx, bx, wh, bh, matmul_dtype=jnp.bfloat16)
    assert jnp.allclose(out, ref_bf16, atol=1e-3, rtol=1e-3), (
        float(jnp.max(jnp.abs(out - ref_bf16))))

    # Looser check against the pure-f32 torch-equivalent reference
    # (difference is only the bf16 quantization of the matmul/blend operands).
    ref_f32 = reference_gru(x, hidden, wx, bx, wh, bh)
    assert jnp.allclose(out, ref_f32, atol=5e-2, rtol=5e-2), (
        float(jnp.max(jnp.abs(out - ref_f32))))

    print("KERNEL_OK")
</pallas_src>

<mosaic_0001>
module attributes {stable_mosaic.version = 11 : i64} {
  func.func @gru_cell_kernel(%arg0: i32, %arg1: memref<16x256xbf16, #tpu.memory_space<vmem>>, %arg2: memref<256x512xbf16, #tpu.memory_space<vmem>>, %arg3: memref<1x512xf32, #tpu.memory_space<vmem>>, %arg4: memref<16x128xf32, #tpu.memory_space<vmem>>, %arg5: memref<16x512xf32, #tpu.memory_space<vmem>>) attributes {dimension_semantics = [#tpu.dimension_semantics<parallel>], iteration_bounds = array<i64: 1>, scalar_prefetch = 0 : i64, scratch_operands = 1 : i64, tpu.core_type = #tpu.core_type<tc>, window_params = [{transform_indices = @transform_0, window_bounds = array<i64: 16, 256>}, {pipeline_mode = #tpu.pipeline_mode<synchronous>, transform_indices = @transform_1, window_bounds = array<i64: 256, 512>}, {pipeline_mode = #tpu.pipeline_mode<synchronous>, transform_indices = @transform_2, window_bounds = array<i64: 1, 512>}, {transform_indices = @transform_3, window_bounds = array<i64: 16, 128>}]} {
    %c0 = arith.constant 0 : index
    %c0_0 = arith.constant 0 : index
    %0 = vector.load %arg1[%c0, %c0_0] : memref<16x256xbf16, #tpu.memory_space<vmem>>, vector<16x256xbf16>
    %c0_1 = arith.constant 0 : index
    %c0_2 = arith.constant 0 : index
    %1 = vector.load %arg2[%c0_1, %c0_2] : memref<256x512xbf16, #tpu.memory_space<vmem>>, vector<256x512xbf16>
    %cst = arith.constant dense<0.000000e+00> : vector<16x512xf32>
    %2 = tpu.matmul %0, %1, %cst {dimension_numbers = #tpu.dot_dimension_numbers<[1], [0], [0], [1], [0, 0, 1, 1], [], []>} : vector<16x256xbf16>, vector<256x512xbf16>, vector<16x512xf32> -> vector<16x512xf32>
    %c0_3 = arith.constant 0 : index
    %c0_4 = arith.constant 0 : index
    %3 = vector.load %arg3[%c0_3, %c0_4] : memref<1x512xf32, #tpu.memory_space<vmem>>, vector<1x512xf32>
    %4 = vector.broadcast %3 : vector<1x512xf32> to vector<16x512xf32>
    %5 = arith.addf %2, %4 : vector<16x512xf32>
    %c0_5 = arith.constant 0 : index
    %c0_6 = arith.constant 0 : index
    %6 = vector.load %arg5[%c0_5, %c0_6] : memref<16x512xf32, #tpu.memory_space<vmem>>, vector<16x512xf32>
    tpu.vector_store %arg5[%c0_5, %c0_6], %5 {strides = array<i32>} : memref<16x512xf32, #tpu.memory_space<vmem>>, vector<16x512xf32>,
    %c0_i32 = arith.constant 0 : i32
    %c16_i32 = arith.constant 16 : i32
    %7 = arith.muli %c0_i32, %c16_i32 : i32
    %8 = tpu.assume_multiple %7, 16 : i32
    %9 = arith.index_cast %8 : i32 to index
    %c0_7 = arith.constant 0 : index
    %10 = vector.load %arg5[%9, %c0_7] : memref<16x512xf32, #tpu.memory_space<vmem>>, vector<16x128xf32>
    %11 = arith.negf %10 : vector<16x128xf32>
    %12 = math.exp %11 : vector<16x128xf32>
    %cst_8 = arith.constant 1.000000e+00 : f32
    %13 = vector.broadcast %cst_8 : f32 to vector<16x128xf32>
    %14 = arith.addf %13, %12 : vector<16x128xf32>
    %15 = arith.divf %13, %14 : vector<16x128xf32>
    %16 = arith.index_cast %8 : i32 to index
    %c128 = arith.constant 128 : index
    %17 = vector.load %arg5[%16, %c128] : memref<16x512xf32, #tpu.memory_space<vmem>>, vector<16x128xf32>
    %18 = arith.negf %17 : vector<16x128xf32>
    %19 = math.exp %18 : vector<16x128xf32>
    %cst_9 = arith.constant 1.000000e+00 : f32
    %20 = vector.broadcast %cst_9 : f32 to vector<16x128xf32>
    %21 = arith.addf %20, %19 : vector<16x128xf32>
    %22 = arith.divf %20, %21 : vector<16x128xf32>
    %23 = arith.index_cast %8 : i32 to index
    %c256 = arith.constant 256 : index
    %24 = vector.load %arg5[%23, %c256] : memref<16x512xf32, #tpu.memory_space<vmem>>, vector<16x128xf32>
    %25 = arith.index_cast %8 : i32 to index
    %c384 = arith.constant 384 : index
    %26 = vector.load %arg5[%25, %c384] : memref<16x512xf32, #tpu.memory_space<vmem>>, vector<16x128xf32>
    %27 = arith.mulf %15, %26 : vector<16x128xf32>
    %28 = arith.addf %24, %27 : vector<16x128xf32>
    %29 = math.tanh %28 : vector<16x128xf32>
    %30 = arith.index_cast %8 : i32 to index
    %c0_10 = arith.constant 0 : index
    %31 = vector.load %arg1[%30, %c0_10] : memref<16x256xbf16, #tpu.memory_space<vmem>>, vector<16x128xbf16>
    %32 = arith.extf %31 : vector<16x128xbf16> to vector<16x128xf32>
    %cst_11 = arith.constant 1.000000e+00 : f32
    %33 = vector.broadcast %cst_11 : f32 to vector<16x128xf32>
    %34 = arith.subf %33, %22 : vector<16x128xf32>
    %35 = arith.mulf %34, %29 : vector<16x128xf32>
    %36 = arith.mulf %22, %32 : vector<16x128xf32>
    %37 = arith.addf %35, %36 : vector<16x128xf32>
    %38 = arith.index_cast %8 : i32 to index
    %c0_12 = arith.constant 0 : index
    %39 = vector.load %arg4[%38, %c0_12] : memref<16x128xf32, #tpu.memory_space<vmem>>, vector<16x128xf32>
    tpu.vector_store %arg4[%38, %c0_12], %37 {strides = array<i32>} : memref<16x128xf32, #tpu.memory_space<vmem>>, vector<16x128xf32>,
    %c1_i32 = arith.constant 1 : i32
    return
  }
  func.func @transform_0(%arg0: i32) -> (i32, i32) {
    %c0_i32 = arith.constant 0 : i32
    %c0_i32_0 = arith.constant 0 : i32
    return %arg0, %c0_i32 : i32, i32
  }
  func.func @transform_1(%arg0: i32) -> (i32, i32) {
    %c0_i32 = arith.constant 0 : i32
    %c0_i32_0 = arith.constant 0 : i32
    %c0_i32_1 = arith.constant 0 : i32
    return %c0_i32, %c0_i32_0 : i32, i32
  }
  func.func @transform_2(%arg0: i32) -> (i32, i32) {
    %c0_i32 = arith.constant 0 : i32
    %c0_i32_0 = arith.constant 0 : i32
    %c0_i32_1 = arith.constant 0 : i32
    return %c0_i32, %c0_i32_0 : i32, i32
  }
  func.func @transform_3(%arg0: i32) -> (i32, i32) {
    %c0_i32 = arith.constant 0 : i32
    %c0_i32_0 = arith.constant 0 : i32
    return %arg0, %c0_i32 : i32, i32
  }
}

</mosaic_0001>

<bundles_post_ra>
// kernel: tpu_custom_call.1
= control target key start
LH: loop header
LB: loop body
LE: loop exit
PB: predicated region body
PF: predicated region fallthrough
CT: control target
= control target key end

     0   :  { %8 = vsyncpa [#allocation4], 0  ;;  %s1300_s0 = inlined_call_operand.hbm [shape: bf16[16,256], index: 0, kind: input, shape index: {}]   ;;  %s1301_s1 = inlined_call_operand.hbm [shape: bf16[256,512], index: 1, kind: input, shape index: {}]   ;;  %s1302_s2 = inlined_call_operand.hbm [shape: f32[1,512], index: 2, kind: input, shape index: {}]   ;;  %s1303_s3 = inlined_call_operand.hbm [shape: f32[16,128], index: 3, kind: output, shape index: {}]  }
   0x1   :  { %9 = vsyncpa [#allocation7], 0  ;;  %s28_s14 = sshll.u32 %s1301_s1, 4  ;;  %s29_s14 = int_to_ptr.hbm [resolvable:$true] %s28_s14 }
   0x2   :  { %10 = vsyncpa [#allocation5], 0  ;;  %s1180_s15 = smov [#allocation6]   ;;  %s15_s19 = sshll.u32 %s1300_s0, 4  ;;  %s16_s19 = int_to_ptr.hbm [resolvable:$true] %s15_s19 }
   0x3   :  { %s30_s16 = sshll.u32 %s1180_s15, 4  ;;  %s1181_s20 = smov 256   ;;  %s31_s16 = int_to_ptr.vmem [resolvable:$true] %s30_s16 }
   0x4   :  { %s1182_s21 = smov 16   ;;  %s1183_s22 = smov [#allocation3]  }
   0x5   :  { %36 = dma.hbm_to_vmem [thread:$0]  %s29_s14, 8192, %s31_s16, [#allocation7], %s1181_s20, %s1181_s20, %s1182_s21  }
   0x6   :  { %s17_s23 = sshll.u32 %s1183_s22, 4  ;;  %s1184_s24 = smov 128   ;;  %s18_s23 = int_to_ptr.vmem [resolvable:$true] %s17_s23 }
   0x7   :  { %s1185_s25 = smov 8   ;;  %s42_s27 = sshll.u32 %s1302_s2, 4  ;;  %s43_s27 = int_to_ptr.hbm [resolvable:$true] %s42_s27 }
   0x8   :  { %23 = dma.hbm_to_vmem [thread:$0]  %s16_s19, 256, %s18_s23, [#allocation4], %s1184_s24, %s1184_s24, %s1185_s25  }
   0x9   :  { %s1186_s28 = smov [#allocation8]  }
   0xa   :  { %s44_s0 = sshll.u32 %s1186_s28, 4  ;;  %s45_s0 = int_to_ptr.vmem [resolvable:$true] %s44_s0 }
   0xb   :  { %47 = dma.hbm_to_vmem [thread:$0]  %s43_s27, 64, %s45_s0, [#allocation7]  }
   0xc   :  { %1174 = dma.done.wait [#allocation4], 256  }
   0xd   :  { %1175 = vsyncadd [#allocation4], 4294967040 }
   0xe   :  { %1176 = dma.done.wait [#allocation7], 8256  }
   0xf   :  { %1177 = vsyncadd [#allocation7], 4294959040  ;;  %v838_v0 = vld [vmem:[#allocation6 + $0xe0] sm:$0xf]  ;;  %v1016_v1 = vld [vmem:[#allocation6 + $0xec] sm:$0xf0] }
  0x10   :  { %v1014_v2 = vld [vmem:[#allocation6 + $0xe4] sm:$0xf]  ;;  %v839_v3 = vor.u32 %v1016_v1, %v838_v0  ;;  %v840_v4 = vld [vmem:[#allocation6 + $0xf0] sm:$0xf0]  ;;  %v966_v9 = vld [vmem:[#allocation6 + $0x1e0] sm:$0xf] }
  0x11   :  { %v1046_v5 = vld [vmem:[#allocation6 + $0x1e4] sm:$0xf]  ;;  %v968_v6 = vld [vmem:[#allocation6 + $0x1f0] sm:$0xf0]  ;;  %v843_v7 = vor.u32 %v1014_v2, %v840_v4  ;;  %v1048_v10 = vld [vmem:[#allocation6 + $0x1ec] sm:$0xf0] }
  0x12   :  { %v971_v8 = vor.u32 %v1046_v5, %v968_v6  ;;  %v822_v11 = vld [vmem:[#allocation6 + $0xc0] sm:$0xf]  ;;  %466 = vmatpush.bf16.msra.mxu0 %v839_v3  ;;  %v967_v12 = vor.u32 %v1048_v10, %v966_v9  ;;  %v1012_v13 = vld [vmem:[#allocation6 + $0xcc] sm:$0xf0]  ;;  %v1010_v14 = vld [vmem:[#allocation6 + $0xc4] sm:$0xf] }
  0x13   :  { %v824_v15 = vld [vmem:[#allocation6 + $0xd0] sm:$0xf0]  ;;  %494 = vmatpush.bf16.msra.mxu2 %v843_v7  ;;  %v823_v16 = vor.u32 %v1012_v13, %v822_v11  ;;  %v1042_v18 = vld [vmem:[#allocation6 + $0x1c4] sm:$0xf]  ;;  %v950_v20 = vld [vmem:[#allocation6 + $0x1c0] sm:$0xf] }
  0x14   :  { %508 = vmatpush.bf16.msra.mxu3 %v971_v8  ;;  %v827_v17 = vor.u32 %v1010_v14, %v824_v15  ;;  %v952_v19 = vld [vmem:[#allocation6 + $0x1d0] sm:$0xf0]  ;;  %480 = vmatpush.bf16.msra.mxu1 %v967_v12  ;;  %v1044_v22 = vld [vmem:[#allocation6 + $0x1cc] sm:$0xf0]  ;;  %v806_v23 = vld [vmem:[#allocation6 + $0xa0] sm:$0xf] }
  0x15   :  { %v955_v21 = vor.u32 %v1042_v18, %v952_v19  ;;  %v1008_v24 = vld [vmem:[#allocation6 + $0xac] sm:$0xf0]  ;;  %v951_v25 = vor.u32 %v1044_v22, %v950_v20  ;;  %v1006_v26 = vld [vmem:[#allocation6 + $0xa4] sm:$0xf]  ;;  %v808_v27 = vld [vmem:[#allocation6 + $0xb0] sm:$0xf0] }
  0x16   :  { %v1038_v28 = vld [vmem:[#allocation6 + $0x1a4] sm:$0xf]  ;;  %467 = vmatpush.bf16.msra.mxu0 %v823_v16  ;;  %v807_v29 = vor.u32 %v1008_v24, %v806_v23  ;;  %v936_v30 = vld [vmem:[#allocation6 + $0x1b0] sm:$0xf0]  ;;  %v934_v31 = vld [vmem:[#allocation6 + $0x1a0] sm:$0xf]  ;;  %v811_v33 = vor.u32 %v1006_v26, %v808_v27 }
  0x17   :  { %v1040_v32 = vld [vmem:[#allocation6 + $0x1ac] sm:$0xf0]  ;;  %495 = vmatpush.bf16.msra.mxu2 %v827_v17  ;;  %v939_v34 = vor.u32 %v1038_v28, %v936_v30  ;;  %v790_v35 = vld [vmem:[#allocation6 + $0x80] sm:$0xf]  ;;  %v1002_v37 = vld [vmem:[#allocation6 + $0x84] sm:$0xf] }
  0x18   :  { %509 = vmatpush.bf16.msra.mxu3 %v955_v21  ;;  %v1004_v36 = vld [vmem:[#allocation6 + $0x8c] sm:$0xf0]  ;;  %481 = vmatpush.bf16.msra.mxu1 %v951_v25  ;;  %v935_v38 = vor.u32 %v1040_v32, %v934_v31  ;;  %v792_v39 = vld [vmem:[#allocation6 + $0x90] sm:$0xf0]  ;;  %v1034_v40 = vld [vmem:[#allocation6 + $0x184] sm:$0xf] }
  0x19   :  { %v920_v41 = vld [vmem:[#allocation6 + $0x190] sm:$0xf0]  ;;  %v918_v42 = vld [vmem:[#allocation6 + $0x180] sm:$0xf]  ;;  %v1036_v43 = vld [vmem:[#allocation6 + $0x18c] sm:$0xf0]  ;;  %v791_v44 = vor.u32 %v1004_v36, %v790_v35  ;;  %v795_v45 = vor.u32 %v1002_v37, %v792_v39 }
  0x1a   :  { %468 = vmatpush.bf16.msra.mxu0 %v807_v29  ;;  %v923_v46 = vor.u32 %v1034_v40, %v920_v41  ;;  %v774_v47 = vld [vmem:[#allocation6 + $0x60] sm:$0xf]  ;;  %v1000_v48 = vld [vmem:[#allocation6 + $0x6c] sm:$0xf0]  ;;  %v998_v49 = vld [vmem:[#allocation6 + $0x64] sm:$0xf]  ;;  %v919_v50 = vor.u32 %v1036_v43, %v918_v42 }
  0x1b   :  { %496 = vmatpush.bf16.msra.mxu2 %v811_v33  ;;  %v776_v51 = vld [vmem:[#allocation6 + $0x70] sm:$0xf0]  ;;  %v1030_v52 = vld [vmem:[#allocation6 + $0x164] sm:$0xf]  ;;  %v902_v54 = vld [vmem:[#allocation6 + $0x160] sm:$0xf]  ;;  %v775_v56 = vor.u32 %v1000_v48, %v774_v47 }
  0x1c   :  { %510 = vmatpush.bf16.msra.mxu3 %v939_v34  ;;  %482 = vmatpush.bf16.msra.mxu1 %v935_v38  ;;  %v904_v53 = vld [vmem:[#allocation6 + $0x170] sm:$0xf0]  ;;  %v1032_v55 = vld [vmem:[#allocation6 + $0x16c] sm:$0xf0]  ;;  %v779_v57 = vor.u32 %v998_v49, %v776_v51  ;;  %v758_v59 = vld [vmem:[#allocation6 + $0x40] sm:$0xf] }
  0x1d   :  { %v907_v58 = vor.u32 %v1030_v52, %v904_v53  ;;  %v996_v60 = vld [vmem:[#allocation6 + $0x4c] sm:$0xf0]  ;;  %v994_v61 = vld [vmem:[#allocation6 + $0x44] sm:$0xf]  ;;  %v903_v62 = vor.u32 %v1032_v55, %v902_v54  ;;  %v760_v63 = vld [vmem:[#allocation6 + $0x50] sm:$0xf0] }
  0x1e   :  { %469 = vmatpush.bf16.msra.mxu0 %v791_v44  ;;  %v1026_v0 = vld [vmem:[#allocation6 + $0x144] sm:$0xf]  ;;  %v888_v1 = vld [vmem:[#allocation6 + $0x150] sm:$0xf0]  ;;  %v886_v2 = vld [vmem:[#allocation6 + $0x140] sm:$0xf]  ;;  %v759_v4 = vor.u32 %v996_v60, %v758_v59  ;;  %v763_v5 = vor.u32 %v994_v61, %v760_v63 }
  0x1f   :  { %497 = vmatpush.bf16.msra.mxu2 %v795_v45  ;;  %v1028_v3 = vld [vmem:[#allocation6 + $0x14c] sm:$0xf0]  ;;  %v891_v6 = vor.u32 %v1026_v0, %v888_v1  ;;  %v742_v7 = vld [vmem:[#allocation6 + $0x20] sm:$0xf]  ;;  %v990_v9 = vld [vmem:[#allocation6 + $0x24] sm:$0xf] }
  0x20   :  { %511 = vmatpush.bf16.msra.mxu3 %v923_v46  ;;  %483 = vmatpush.bf16.msra.mxu1 %v919_v50  ;;  %v992_v8 = vld [vmem:[#allocation6 + $0x2c] sm:$0xf0]  ;;  %v887_v10 = vor.u32 %v1028_v3, %v886_v2  ;;  %v744_v11 = vld [vmem:[#allocation6 + $0x30] sm:$0xf0]  ;;  %v1022_v12 = vld [vmem:[#allocation6 + $0x124] sm:$0xf] }
  0x21   :  { %v872_v13 = vld [vmem:[#allocation6 + $0x130] sm:$0xf0]  ;;  %v870_v14 = vld [vmem:[#allocation6 + $0x120] sm:$0xf]  ;;  %v1024_v15 = vld [vmem:[#allocation6 + $0x12c] sm:$0xf0]  ;;  %v743_v16 = vor.u32 %v992_v8, %v742_v7  ;;  %v747_v19 = vor.u32 %v990_v9, %v744_v11 }
  0x22   :  { %470 = vmatpush.bf16.msra.mxu0 %v775_v56  ;;  %v726_v17 = vld [vmem:[#allocation6] sm:$0xf]  ;;  %v988_v18 = vld [vmem:[#allocation6 + $0xc] sm:$0xf0]  ;;  %v875_v20 = vor.u32 %v1022_v12, %v872_v13  ;;  %v986_v21 = vld [vmem:[#allocation6 + $0x4] sm:$0xf]  ;;  %v871_v24 = vor.u32 %v1024_v15, %v870_v14 }
  0x23   :  { %498 = vmatpush.bf16.msra.mxu2 %v779_v57  ;;  %v728_v22 = vld [vmem:[#allocation6 + $0x10] sm:$0xf0]  ;;  %v1018_v23 = vld [vmem:[#allocation6 + $0x104] sm:$0xf]  ;;  %v854_v26 = vld [vmem:[#allocation6 + $0x100] sm:$0xf]  ;;  %v727_v31 = vor.u32 %v988_v18, %v726_v17 }
  0x24   :  { %512 = vmatpush.bf16.msra.mxu3 %v907_v58  ;;  %484 = vmatpush.bf16.msra.mxu1 %v903_v62  ;;  %v856_v25 = vld [vmem:[#allocation6 + $0x110] sm:$0xf0]  ;;  %v1020_v27 = vld [vmem:[#allocation6 + $0x10c] sm:$0xf0]  ;;  %v846_v28 = vld [vmem:[#allocation6 + $0xe8] sm:$0xf]  ;;  %v731_v35 = vor.u32 %v986_v21, %v728_v22 }
  0x25   :  { %v1017_v29 = vld [vmem:[#allocation6 + $0xf4] sm:$0xf0]  ;;  %v1015_v30 = vld [vmem:[#allocation6 + $0xec] sm:$0xf]  ;;  %v848_v32 = vld [vmem:[#allocation6 + $0xf8] sm:$0xf0]  ;;  %v859_v36 = vor.u32 %v1018_v23, %v856_v25  ;;  %v855_v40 = vor.u32 %v1020_v27, %v854_v26 }
  0x26   :  { %471 = vmatpush.bf16.msra.mxu0 %v759_v4  ;;  %v1047_v33 = vld [vmem:[#allocation6 + $0x1ec] sm:$0xf]  ;;  %v976_v34 = vld [vmem:[#allocation6 + $0x1f8] sm:$0xf0]  ;;  %v718_v37 = vld [vmem:[#allocation3] sm:$0xf]  ;;  %v847_v41 = vor.u32 %v1017_v29, %v846_v28  ;;  %v851_v45 = vor.u32 %v1015_v30, %v848_v32 }
  0x27   :  { %499 = vmatpush.bf16.msra.mxu2 %v763_v5  ;;  %v985_v38 = vld [vmem:[#allocation3 + $0x4] sm:$0xf0]  ;;  %v974_v39 = vld [vmem:[#allocation6 + $0x1e8] sm:$0xf]  ;;  %v984_v43 = vld [vmem:[#allocation3 + $0x4] sm:$0xf]  ;;  %v979_v46 = vor.u32 %v1047_v33, %v976_v34 }
  0x28   :  { %513 = vmatpush.bf16.msra.mxu3 %v891_v6  ;;  %485 = vmatpush.bf16.msra.mxu1 %v887_v10  ;;  %v1049_v42 = vld [vmem:[#allocation6 + $0x1f4] sm:$0xf0]  ;;  %v720_v44 = vld [vmem:[#allocation3 + $0x8] sm:$0xf0]  ;;  %v830_v47 = vld [vmem:[#allocation6 + $0xc8] sm:$0xf]  ;;  %v1220_v50 = vor.u32 %v985_v38, %v718_v37 }
  0x29   :  { %v1013_v48 = vld [vmem:[#allocation6 + $0xd4] sm:$0xf0]  ;;  %v1011_v49 = vld [vmem:[#allocation6 + $0xcc] sm:$0xf]  ;;  %v832_v51 = vld [vmem:[#allocation6 + $0xd8] sm:$0xf0]  ;;  %v975_v54 = vor.u32 %v1049_v42, %v974_v39  ;;  %v1222_v55 = vor.u32 %v984_v43, %v720_v44 }
  0x2a   :  { %472 = vmatpush.bf16.msra.mxu0 %v743_v16  ;;  %v1043_v52 = vld [vmem:[#allocation6 + $0x1cc] sm:$0xf]  ;;  %v960_v53 = vld [vmem:[#allocation6 + $0x1d8] sm:$0xf0]  ;;  %v831_v56 = vor.u32 %v1013_v48, %v830_v47  ;;  %v958_v57 = vld [vmem:[#allocation6 + $0x1c8] sm:$0xf]  ;;  %v835_v59 = vor.u32 %v1011_v49, %v832_v51 }
  0x2b   :  { %500 = vmatpush.bf16.msra.mxu2 %v747_v19  ;;  %v1045_v58 = vld [vmem:[#allocation6 + $0x1d4] sm:$0xf0]  ;;  %v963_v60 = vor.u32 %v1043_v52, %v960_v53  ;;  %v814_v61 = vld [vmem:[#allocation6 + $0xa8] sm:$0xf]  ;;  %v1007_v63 = vld [vmem:[#allocation6 + $0xac] sm:$0xf] }
  0x2c   :  { %514 = vmatpush.bf16.msra.mxu3 %v875_v20  ;;  %486 = vmatpush.bf16.msra.mxu1 %v871_v24  ;;  %v1009_v62 = vld [vmem:[#allocation6 + $0xb4] sm:$0xf0]  ;;  %v816_v0 = vld [vmem:[#allocation6 + $0xb8] sm:$0xf0]  ;;  %v1039_v1 = vld [vmem:[#allocation6 + $0x1ac] sm:$0xf]  ;;  %v959_v3 = vor.u32 %v1045_v58, %v958_v57 }
  0x2d   :  { %v944_v2 = vld [vmem:[#allocation6 + $0x1b8] sm:$0xf0]  ;;  %v815_v4 = vor.u32 %v1009_v62, %v814_v61  ;;  %v942_v5 = vld [vmem:[#allocation6 + $0x1a8] sm:$0xf]  ;;  %v1041_v6 = vld [vmem:[#allocation6 + $0x1b4] sm:$0xf0]  ;;  %v819_v7 = vor.u32 %v1007_v63, %v816_v0 }
  0x2e   :  { %473 = vmatpush.bf16.msra.mxu0 %v727_v31  ;;  %v947_v8 = vor.u32 %v1039_v1, %v944_v2  ;;  %v798_v9 = vld [vmem:[#allocation6 + $0x88] sm:$0xf]  ;;  %v1005_v10 = vld [vmem:[#allocation6 + $0x94] sm:$0xf0]  ;;  %v1003_v11 = vld [vmem:[#allocation6 + $0x8c] sm:$0xf]  ;;  %v943_v15 = vor.u32 %v1041_v6, %v942_v5 }
  0x2f   :  { %501 = vmatpush.bf16.msra.mxu2 %v731_v35  ;;  %v800_v12 = vld [vmem:[#allocation6 + $0x98] sm:$0xf0]  ;;  %v1035_v13 = vld [vmem:[#allocation6 + $0x18c] sm:$0xf]  ;;  %v799_v16 = vor.u32 %v1005_v10, %v798_v9  ;;  %v926_v17 = vld [vmem:[#allocation6 + $0x188] sm:$0xf] }
  0x30   :  { %515 = vmatpush.bf16.msra.mxu3 %v859_v36  ;;  %487 = vmatpush.bf16.msra.mxu1 %v855_v40  ;;  %v928_v14 = vld [vmem:[#allocation6 + $0x198] sm:$0xf0]  ;;  %v1037_v18 = vld [vmem:[#allocation6 + $0x194] sm:$0xf0]  ;;  %v803_v19 = vor.u32 %v1003_v11, %v800_v12  ;;  %v782_v21 = vld [vmem:[#allocation6 + $0x68] sm:$0xf] }
  0x31   :  { %474 = vmatmul.bf16.vlgmr.msra.gmra.mxu0 %v1220_v50  ;;  %v931_v20 = vor.u32 %v1035_v13, %v928_v14  ;;  %v1001_v22 = vld [vmem:[#allocation6 + $0x74] sm:$0xf0]  ;;  %v999_v23 = vld [vmem:[#allocation6 + $0x6c] sm:$0xf]  ;;  %v784_v24 = vld [vmem:[#allocation6 + $0x78] sm:$0xf0]  ;;  %v927_v27 = vor.u32 %v1037_v18, %v926_v17 }
  0x32   :  { %522 = vmatpush.bf16.msrb.mxu0 %v847_v41  ;;  %502 = vmatmul.bf16.vlgmr.msra.gmra.mxu2 %v1220_v50  ;;  %v1031_v25 = vld [vmem:[#allocation6 + $0x16c] sm:$0xf]  ;;  %v912_v26 = vld [vmem:[#allocation6 + $0x178] sm:$0xf0]  ;;  %v783_v28 = vor.u32 %v1001_v22, %v782_v21  ;;  %v910_v29 = vld [vmem:[#allocation6 + $0x168] sm:$0xf]  ;;  %v787_v31 = vor.u32 %v999_v23, %v784_v24 }
  0x33   :  { %550 = vmatpush.bf16.msrb.mxu2 %v851_v45  ;;  %516 = vmatmul.bf16.vlgmr.msra.gmra.mxu3 %v1222_v55  ;;  %v1033_v30 = vld [vmem:[#allocation6 + $0x174] sm:$0xf0]  ;;  %v915_v32 = vor.u32 %v1031_v25, %v912_v26  ;;  %v766_v33 = vld [vmem:[#allocation6 + $0x48] sm:$0xf]  ;;  %v995_v35 = vld [vmem:[#allocation6 + $0x4c] sm:$0xf] }
  0x34   :  { %564 = vmatpush.bf16.msrb.mxu3 %v979_v46  ;;  %536 = vmatpush.bf16.msrb.mxu1 %v975_v54  ;;  %v997_v34 = vld [vmem:[#allocation6 + $0x54] sm:$0xf0]  ;;  %v768_v36 = vld [vmem:[#allocation6 + $0x58] sm:$0xf0]  ;;  %v1027_v37 = vld [vmem:[#allocation6 + $0x14c] sm:$0xf]  ;;  %v911_v39 = vor.u32 %v1033_v30, %v910_v29 }
  0x35   :  { %488 = vmatmul.bf16.vlgmr.msra.gmra.mxu1 %v1222_v55  ;;  %v896_v38 = vld [vmem:[#allocation6 + $0x158] sm:$0xf0]  ;;  %v767_v40 = vor.u32 %v997_v34, %v766_v33  ;;  %v894_v41 = vld [vmem:[#allocation6 + $0x148] sm:$0xf]  ;;  %v1029_v42 = vld [vmem:[#allocation6 + $0x154] sm:$0xf0]  ;;  %v771_v43 = vor.u32 %v995_v35, %v768_v36 }
  0x36   :  { %523 = vmatpush.bf16.msrb.mxu0 %v831_v56  ;;  %v899_v44 = vor.u32 %v1027_v37, %v896_v38  ;;  %v750_v45 = vld [vmem:[#allocation6 + $0x28] sm:$0xf]  ;;  %v993_v46 = vld [vmem:[#allocation6 + $0x34] sm:$0xf0]  ;;  %v991_v47 = vld [vmem:[#allocation6 + $0x2c] sm:$0xf]  ;;  %v895_v52 = vor.u32 %v1029_v42, %v894_v41 }
  0x37   :  { %551 = vmatpush.bf16.msrb.mxu2 %v835_v59  ;;  %v752_v48 = vld [vmem:[#allocation6 + $0x38] sm:$0xf0]  ;;  %v1023_v49 = vld [vmem:[#allocation6 + $0x12c] sm:$0xf]  ;;  %v751_v53 = vor.u32 %v993_v46, %v750_v45  ;;  %v878_v54 = vld [vmem:[#allocation6 + $0x128] sm:$0xf] }
  0x38   :  { %565 = vmatpush.bf16.msrb.mxu3 %v963_v60  ;;  %537 = vmatpush.bf16.msrb.mxu1 %v959_v3  ;;  %v880_v51 = vld [vmem:[#allocation6 + $0x138] sm:$0xf0]  ;;  %v1025_v56 = vld [vmem:[#allocation6 + $0x134] sm:$0xf0]  ;;  %v755_v57 = vor.u32 %v991_v47, %v752_v48  ;;  %v734_v59 = vld [vmem:[#allocation6 + $0x8] sm:$0xf] }
  0x39   :  { %v883_v58 = vor.u32 %v1023_v49, %v880_v51  ;;  %v989_v60 = vld [vmem:[#allocation6 + $0x14] sm:$0xf0]  ;;  %v987_v61 = vld [vmem:[#allocation6 + $0xc] sm:$0xf]  ;;  %v736_v62 = vld [vmem:[#allocation6 + $0x18] sm:$0xf0]  ;;  %v879_v1 = vor.u32 %v1025_v56, %v878_v54 }
  0x3a   :  { %524 = vmatpush.bf16.msrb.mxu0 %v815_v4  ;;  %v1019_v63 = vld [vmem:[#allocation6 + $0x10c] sm:$0xf]  ;;  %v864_v0 = vld [vmem:[#allocation6 + $0x118] sm:$0xf0]  ;;  %v735_v2 = vor.u32 %v989_v60, %v734_v59  ;;  %v862_v3 = vld [vmem:[#allocation6 + $0x108] sm:$0xf]  ;;  %v739_v5 = vor.u32 %v987_v61, %v736_v62 }
  0x3b   :  { %552 = vmatpush.bf16.msrb.mxu2 %v819_v7  ;;  %v1021_v4 = vld [vmem:[#allocation6 + $0x114] sm:$0xf0]  ;;  %v867_v6 = vor.u32 %v1019_v63, %v864_v0  ;;  %s1187_s2 = smov [#allocation9]   ;;  %s702_s5 = sshll.u32 %s1303_s3, 4  ;;  %s703_s5 = int_to_ptr.hbm [resolvable:$true] %s702_s5 }
  0x3c   :  { %566 = vmatpush.bf16.msrb.mxu3 %v947_v8  ;;  %538 = vmatpush.bf16.msrb.mxu1 %v943_v15  ;;  %v863_v7 = vor.u32 %v1021_v4, %v862_v3  ;;  %v1232_v8 = vld [vmem:[#allocation8] sm:$0xf]  ;;  %s700_s29 = sshll.u32 %s1187_s2, 4  ;;  %s701_s29 = int_to_ptr.vmem [resolvable:$true] %s700_s29 }
  0x3d   :  { %v128_v9 = vperm.slane %v1232_v8, 0  ;;  %v129_v14 = vperm.slane %v1232_v8, 1  ;;  %v131_v48 = vperm.slane %v1232_v8, 3 }
  0x3e   :  { %525 = vmatpush.bf16.msrb.mxu0 %v799_v16 }
  0x3f   :  { %553 = vmatpush.bf16.msrb.mxu2 %v803_v19 }
  0x40   :  { %567 = vmatpush.bf16.msrb.mxu3 %v931_v20  ;;  %539 = vmatpush.bf16.msrb.mxu1 %v927_v27 }
  0x42   :  { %526 = vmatpush.bf16.msrb.mxu0 %v783_v28 }
  0x43   :  { %554 = vmatpush.bf16.msrb.mxu2 %v787_v31 }
  0x44   :  { %568 = vmatpush.bf16.msrb.mxu3 %v915_v32  ;;  %540 = vmatpush.bf16.msrb.mxu1 %v911_v39 }
  0x46   :  { %527 = vmatpush.bf16.msrb.mxu0 %v767_v40 }
  0x47   :  { %555 = vmatpush.bf16.msrb.mxu2 %v771_v43 }
  0x48   :  { %569 = vmatpush.bf16.msrb.mxu3 %v899_v44  ;;  %541 = vmatpush.bf16.msrb.mxu1 %v895_v52  ;;  %v130_v44 = vperm.slane %v1232_v8, 2 }
  0x4a   :  { %528 = vmatpush.bf16.msrb.mxu0 %v751_v53 }
  0x4b   :  { %556 = vmatpush.bf16.msrb.mxu2 %v755_v57 }
  0x4c   :  { %570 = vmatpush.bf16.msrb.mxu3 %v883_v58  ;;  %542 = vmatpush.bf16.msrb.mxu1 %v879_v1 }
  0x4e   :  { %529 = vmatpush.bf16.msrb.mxu0 %v735_v2 }
  0x4f   :  { %557 = vmatpush.bf16.msrb.mxu2 %v739_v5 }
  0x50   :  { %571 = vmatpush.bf16.msrb.mxu3 %v867_v6  ;;  %543 = vmatpush.bf16.msrb.mxu1 %v863_v7 }
  0x51   :  { %530 = vmatmul.bf16.vlgmr.msrb.gmra.mxu0 %v1220_v50 }
  0x52   :  { %558 = vmatmul.bf16.vlgmr.msrb.gmra.mxu2 %v1220_v50 }
  0x53   :  { %572 = vmatmul.bf16.vlgmr.msrb.gmra.mxu3 %v1222_v55  ;;  %544 = vmatmul.bf16.vlgmr.msrb.gmra.mxu1 %v1222_v55 }
  0xae   :  { %v475_v10 = vpop.f32.mrf.mxu0 }
  0xaf   :  { %v476_v11 = vadd.f32 %v475_v10, %v128_v9 }
  0xb2   :  { %v489_v12 = vpop.f32.mrf.mxu1 }
  0xb3   :  { %v490_v13 = vadd.f32 %v489_v12, %v476_v11 }
  0xb5   :  { %v980_v15 = vmul.f32 -1.442695, %v490_v13  ;;  %v503_v16 = vpop.f32.mrf.mxu2 }
  0xb6   :  { %v504_v17 = vadd.f32 %v503_v16, %v129_v14  ;;  %v517_v18 = vpop.f32.mrf.mxu3  ;;  %v477_v50 = vpop.f32.mrf.mxu0 }
  0xb7   :  { %1058 = vpow2.f32 %v980_v15  ;;  %v478_v19 = vadd.f32 %v477_v50, %v128_v9 }
  0xb8   :  { %v518_v20 = vadd.f32 %v517_v18, %v504_v17 }
  0xba   :  { %v491_v21 = vpop.f32.mrf.mxu1  ;;  %v982_v55 = vmul.f32 -1.442695, %v518_v20 }
  0xbb   :  { %v492_v22 = vadd.f32 %v491_v21, %v478_v19 }
  0xbc   :  { %1060 = vpow2.f32 %v982_v55 }
  0xbd   :  { %v1059_v23 = vpop.eup %1058  ;;  %v981_v24 = vmul.f32 -1.442695, %v492_v22  ;;  %v505_v26 = vpop.f32.mrf.mxu2  ;;  %v682_v22 = vld [vmem:[#allocation3] sm:$0xf] }
  0xbe   :  { %v597_v25 = vadd.f32 1.0, %v1059_v23  ;;  %v506_v27 = vadd.f32 %v505_v26, %v129_v14  ;;  %v519_v28 = vpop.f32.mrf.mxu3 }
  0xbf   :  { %1062 = vpow2.f32 %v981_v24 }
  0xc0   :  { %1064 = vrcp.f32 %v597_v25  ;;  %v520_v29 = vadd.f32 %v519_v28, %v506_v27  ;;  %vm604_vm0 = vweird.f32 %v597_v25  ;;  %v608_v52 = vand.u32 2147483647, %v597_v25 }
  0xc1   :  { %v610_v53 = vand.u32 2147483648, %v597_v25 }
  0xc2   :  { %v1061_v30 = vpop.eup %1060  ;;  %v983_v31 = vmul.f32 -1.442695, %v520_v29  ;;  %vm609_vm3 = vcmp.eq.f32.partialorder %v608_v52, 8.507059e+37 }
  0xc3   :  { %v1236_v32 = vadd.f32 1.0, %v1061_v30  ;;  %v611_v1 = vor.u32 1.1754944e-38, %v610_v53  ;;  %v684_v30 = vunpack.c.l.bf16 %v682_v22 }
  0xc4   :  { %1066 = vpow2.f32 %v983_v31 }
  0xc5   :  { %v1063_v33 = vpop.eup %1062  ;;  %1068 = vrcp.f32 %v1236_v32  ;;  %vm644_vm4 = vweird.f32 %v1236_v32  ;;  %v650_v4 = vand.u32 2147483648, %v1236_v32  ;;  %v648_v12 = vand.u32 2147483647, %v1236_v32 }
  0xc6   :  { %v1065_v34 = vpop.eup %1064  ;;  %v1239_v35 = vadd.f32 1.0, %v1063_v33 }
  0xc7   :  { %v600_v36 = vmul.f32 %v1065_v34, %v597_v25  ;;  %vm605_vm1 = vweird.f32 %v1065_v34  ;;  %v651_v19 = vor.u32 1.1754944e-38, %v650_v4  ;;  %vm649_vm10 = vcmp.eq.f32.partialorder %v648_v12, 8.507059e+37 }
  0xc8   :  { %1070 = vrcp.f32 %v1239_v35  ;;  %vm606_vm2 = vmor %vm604_vm0, %vm605_vm1  ;;  %v625_v11 = vand.u32 2147483648, %v1239_v35  ;;  %vm619_vm7 = vweird.f32 %v1239_v35  ;;  %v623_v14 = vand.u32 2147483647, %v1239_v35 }
  0xc9   :  { %v601_v37 = vsub.f32 1.0, %v600_v36 }
  0xca   :  { %v1067_v38 = vpop.eup %1066  ;;  %v626_v25 = vor.u32 1.1754944e-38, %v625_v11  ;;  %vm624_vm11 = vcmp.eq.f32.partialorder %v623_v14, 8.507059e+37 }
  0xcb   :  { %v1242_v39 = vpop.eup %1068  ;;  %v1244_v40 = vadd.f32 1.0, %v1067_v38  ;;  %v602_v42 = vmul.f32 %v1065_v34, %v601_v37 }
  0xcc   :  { %v640_v41 = vmul.f32 %v1242_v39, %v1236_v32  ;;  %vm645_vm5 = vweird.f32 %v1242_v39 }
  0xcd   :  { %1072 = vrcp.f32 %v1244_v40  ;;  %v603_v49 = vadd.f32 %v1065_v34, %v602_v42  ;;  %vm1273_vm8 = vmor %vm644_vm4, %vm645_vm5  ;;  %v665_v33 = vand.u32 2147483648, %v1244_v40  ;;  %vm659_vm13 = vweird.f32 %v1244_v40 }
  0xce   :  { %v1248_v43 = vpop.eup %1070  ;;  %v641_v46 = vsub.f32 1.0, %v640_v41  ;;  %v531_v47 = vpop.f32.mrf.mxu0 }
  0xcf   :  { %v615_v45 = vmul.f32 %v1248_v43, %v1239_v35  ;;  %v532_v54 = vadd.f32 %v531_v47, %v130_v44  ;;  %v607_v63 = vsel %vm606_vm2, %v1065_v34, %v603_v49  ;;  %vm620_vm6 = vweird.f32 %v1248_v43 }
  0xd0   :  { %v545_v56 = vpop.f32.mrf.mxu1  ;;  %v642_v58 = vmul.f32 %v1242_v39, %v641_v46  ;;  %v612_v6 = vsel %vm609_vm3, %v611_v1, %v607_v63  ;;  %vm1278_vm9 = vmor %vm619_vm7, %vm620_vm6  ;;  %v663_v34 = vand.u32 2147483647, %v1244_v40  ;;  %v666_v42 = vor.u32 1.1754944e-38, %v665_v33 }
  0xd1   :  { %v616_v51 = vsub.f32 1.0, %v615_v45  ;;  %v546_v2 = vadd.f32 %v545_v56, %v532_v54 }
  0xd2   :  { %v643_v7 = vadd.f32 %v1242_v39, %v642_v58  ;;  %vm664_vm15 = vcmp.eq.f32.partialorder %v663_v34, 8.507059e+37 }
  0xd3   :  { %v1255_v57 = vpop.eup %1072  ;;  %v617_v0 = vmul.f32 %v1248_v43, %v616_v51 }
  0xd4   :  { %v655_v61 = vmul.f32 %v1255_v57, %v1244_v40  ;;  %v647_v50 = vsel %vm1273_vm8, %v1242_v39, %v643_v7  ;;  %vm660_vm12 = vweird.f32 %v1255_v57 }
  0xd5   :  { %v559_v59 = vpop.f32.mrf.mxu2  ;;  %v618_v9 = vadd.f32 %v1248_v43, %v617_v0  ;;  %v652_v27 = vsel %vm649_vm10, %v651_v19, %v647_v50  ;;  %vm661_vm14 = vmor %vm659_vm13, %vm660_vm12 }
  0xd6   :  { %v573_v60 = vpop.f32.mrf.mxu3  ;;  %v560_v62 = vadd.f32 %v559_v59, %v131_v48  ;;  %v656_v5 = vsub.f32 1.0, %v655_v61  ;;  %v533_v10 = vpop.f32.mrf.mxu0  ;;  %v686_v35 = vsub.f32 1.0, %v652_v27  ;;  %v690_v41 = vmul.f32 %v684_v30, %v652_v27 }
  0xd7   :  { %v534_v20 = vadd.f32 %v533_v10, %v130_v44  ;;  %v622_v55 = vsel %vm1278_vm9, %v1248_v43, %v618_v9  ;;  %v683_v43 = vld [vmem:[#allocation3 + $0x8] sm:$0xf] }
  0xd8   :  { %v574_v3 = vadd.f32 %v573_v60, %v560_v62  ;;  %v657_v16 = vmul.f32 %v1255_v57, %v656_v5  ;;  %v547_v23 = vpop.f32.mrf.mxu1  ;;  %v627_v28 = vsel %vm624_vm11, %v626_v25, %v622_v55  ;;  %v685_v46 = vunpack.c.l.bf16 %v683_v43 }
  0xd9   :  { %v548_v31 = vadd.f32 %v547_v23, %v534_v20 }
  0xda   :  { %v673_v8 = vmul.f32 %v612_v6, %v574_v3  ;;  %v658_v29 = vadd.f32 %v1255_v57, %v657_v16 }
  0xdc   :  { %v675_v13 = vadd.f32 %v673_v8, %v546_v2  ;;  %v662_v38 = vsel %vm661_vm14, %v1255_v57, %v658_v29 }
  0xdd   :  { %v561_v17 = vpop.f32.mrf.mxu2  ;;  %v667_v45 = vsel %vm664_vm15, %v666_v42, %v662_v38 }
  0xde   :  { %1074 = vtanh.f32 %v675_v13  ;;  %v562_v21 = vadd.f32 %v561_v17, %v131_v48  ;;  %v575_v24 = vpop.f32.mrf.mxu3  ;;  %v687_v47 = vsub.f32 1.0, %v667_v45  ;;  %v691_v49 = vmul.f32 %v685_v46, %v667_v45 }
  0xe0   :  { %v576_v26 = vadd.f32 %v575_v24, %v562_v21 }
  0xe2   :  { %v674_v32 = vmul.f32 %v627_v28, %v576_v26 }
  0xe4   :  { %v1075_v36 = vpop.eup %1074  ;;  %v676_v37 = vadd.f32 %v674_v32, %v548_v31 }
  0xe5   :  { %v688_v39 = vmul.f32 %v1075_v36, %v686_v35 }
  0xe6   :  { %1076 = vtanh.f32 %v676_v37 }
  0xe7   :  { %v692_v44 = vadd.f32 %v690_v41, %v688_v39 }
  0xe9   :  { %694 = vst [vmem:[#allocation9] sm:$0xff] %v692_v44 }
  0xec   :  { %v1077_v48 = vpop.eup %1076 }
  0xed   :  { %v689_v40 = vmul.f32 %v1077_v48, %v687_v47 }
  0xef   :  { %v693_v51 = vadd.f32 %v691_v49, %v689_v40 }
  0xf1   :  { %695 = vst [vmem:[#allocation9 + $0x8] sm:$0xff] %v693_v51 }
  0xf2   :  { %708 = dma.vmem_to_hbm [thread:$0]  %s701_s29, 256, %s703_s5, [#allocation5], %s1184_s24, %s1184_s24, %s1185_s25  }
  0xf3   :  { %1178 = dma.done.wait [#allocation5], 256  }
  0xf4   :  { %1179 = vsyncadd [#allocation5], 4294967040 }
  0xf5   :  { %713 = vsyncpa [#allocation4], 1 }
  0xf6   :  { %714 = vsyncpa [#allocation7], 1 }
  0xf7   :  { %715 = vsyncpa [#allocation5], 1 }

</bundles_post_ra>
